<compile_context>
chip_gen: v6e
topology: v6e:2x2x1
jax: 0.10.0
libtpu: 0.0.40
codegen_flags: <defaults>
</compile_context>

<pallas_src>
import jax
import jax.numpy as jnp
from jax.experimental import pallas as pl
from jax.experimental.pallas import tpu as pltpu

LN_EPS = 1e-5  # torch.nn.LayerNorm default

# Flipped to False (once) if this jax build rejects pl.Buffered(1) specs.
_WEIGHTS_SINGLE_BUFFER = True


def _round_up(x, m):
    return pl.cdiv(x, m) * m


def _prediction_kernel(x_ref, w1_ref, b1_ref, g_ref, bta_ref,
                       w2_ref, b2_ref, w3_ref, b3_ref, o_ref):
    # In-kernel bf16 cast of the f32 activation tile (free in the VALU slot;
    # avoids a separate pre-kernel XLA cast pass / extra HBM round-trip).
    x = x_ref[...].astype(w1_ref.dtype)

    # Linear 1 (bf16 MXU operands, f32 accumulation)
    h = jnp.dot(x, w1_ref[...], preferred_element_type=jnp.float32) + b1_ref[...]

    # LayerNorm over the feature axis (f32 statistics; reuse (h - mu) temp).
    mu = jnp.mean(h, axis=-1, keepdims=True)
    centered = h - mu
    var = jnp.mean(centered * centered, axis=-1, keepdims=True)
    h = centered * jax.lax.rsqrt(var + LN_EPS)
    h = h * g_ref[...] + bta_ref[...]

    # Dropout(p=0.25) -> identity in eval mode; then ReLU
    h = jnp.maximum(h, 0.0)

    # Linear 2 + ReLU (+ eval-mode dropout = identity)
    h = jnp.dot(h.astype(w2_ref.dtype), w2_ref[...],
                preferred_element_type=jnp.float32) + b2_ref[...]
    h = jnp.maximum(h, 0.0)

    # Linear 3 (output columns zero-padded to a lane-dense multiple of 128)
    out = jnp.dot(h.astype(w3_ref.dtype), w3_ref[...],
                  preferred_element_type=jnp.float32) + b3_ref[...]
    o_ref[...] = out.astype(o_ref.dtype)


def prepare_params(params, *, matmul_dtype=jnp.bfloat16):
    """One-time weight prep: bf16 MXU operands + lane-dense padding of w3/b3.

    Do this once (at load / init) and reuse the result for every forward call,
    so the per-call path never re-reads the f32 weights from HBM.
    """
    w1, b1, gamma, beta, w2, b2, w3, b3 = params
    d_out = w3.shape[1]
    out_pad = _round_up(d_out, 128)

    w1c = w1.astype(matmul_dtype)
    w2c = w2.astype(matmul_dtype)
    w3c = w3.astype(matmul_dtype)
    b3p = b3
    if out_pad != d_out:
        w3c = jnp.pad(w3c, ((0, 0), (0, out_pad - d_out)))
        b3p = jnp.pad(b3, ((0, 0), (0, out_pad - d_out)))

    return dict(w1=w1c, b1=b1, gamma=gamma, beta=beta,
                w2=w2c, b2=b2, w3=w3c, b3=b3p, d_out=d_out)


def prediction_forward(x, prepared, *, block_rows=1024, min_grid_steps=1):
    """x: (N, input_dim) float32; `prepared` from prepare_params().

    Returns (N, out_dim) float32.
    min_grid_steps > 1 splits the parallel row axis (useful on v7x megacore
    for large compute-bound batches; keep 1 for small latency-bound N).
    """
    global _WEIGHTS_SINGLE_BUFFER

    w1, b1, gamma, beta = prepared["w1"], prepared["b1"], prepared["gamma"], prepared["beta"]
    w2, b2, w3, b3 = prepared["w2"], prepared["b2"], prepared["w3"], prepared["b3"]
    d_out = prepared["d_out"]

    N, d_in = x.shape
    h1 = w1.shape[1]
    h2 = w2.shape[1]
    out_pad = w3.shape[1]

    # Row tile: 16-aligned (bf16 packs two rows per sublane), as large as
    # possible up to block_rows; optionally split for min_grid_steps cores.
    ROW_ALIGN = 16
    n_aligned = _round_up(N, ROW_ALIGN)
    tm = min(_round_up(block_rows, ROW_ALIGN), n_aligned)
    if min_grid_steps > 1:
        tm = min(tm, _round_up(pl.cdiv(n_aligned, min_grid_steps), ROW_ALIGN))
    tm = max(ROW_ALIGN, tm)

    n_pad = _round_up(N, tm)
    if n_pad != N:
        # NOTE: padded tail rows go through LayerNorm with var=0 and produce
        # rsqrt(eps)-scaled garbage (finite, no NaN/Inf); they are sliced off
        # below, never read.
        x = jnp.pad(x, ((0, n_pad - N), (0, 0)))

    grid_steps = n_pad // tm

    flops = 2 * n_pad * (d_in * h1 + h1 * h2 + h2 * out_pad)
    bytes_accessed = (
        n_pad * d_in * 4
        + sum(int(a.size) * a.dtype.itemsize
              for a in (w1, b1, gamma, beta, w2, b2, w3, b3))
        + n_pad * out_pad * 4)
    cost = pl.CostEstimate(flops=flops, transcendentals=n_pad,
                           bytes_accessed=bytes_accessed)

    def run(single_buffer_weights):
        def const_spec(shape):
            # Grid-invariant operand (constant index_map): single-buffer it,
            # no point double-buffering something that never changes.
            if single_buffer_weights:
                return pl.BlockSpec(shape, lambda i: (0, 0),
                                    pipeline_mode=pl.Buffered(1))
            return pl.BlockSpec(shape, lambda i: (0, 0))

        return pl.pallas_call(
            _prediction_kernel,
            out_shape=jax.ShapeDtypeStruct((n_pad, out_pad), jnp.float32),
            grid_spec=pltpu.PrefetchScalarGridSpec(
                num_scalar_prefetch=0,
                grid=(grid_steps,),
                in_specs=[
                    pl.BlockSpec((tm, d_in), lambda i: (i, 0)),  # x tile (f32)
                    const_spec((d_in, h1)),                      # w1 (bf16)
                    const_spec((1, h1)),                         # b1 (f32)
                    const_spec((1, h1)),                         # LN gamma
                    const_spec((1, h1)),                         # LN beta
                    const_spec((h1, h2)),                        # w2 (bf16)
                    const_spec((1, h2)),                         # b2
                    const_spec((h2, out_pad)),                   # w3 (bf16, padded)
                    const_spec((1, out_pad)),                    # b3 (padded)
                ],
                out_specs=pl.BlockSpec((tm, out_pad), lambda i: (i, 0)),
            ),
            compiler_params=pltpu.CompilerParams(
                dimension_semantics=("parallel",)),
            cost_estimate=cost,
        )(x, w1, b1, gamma, beta, w2, b2, w3, b3)

    if _WEIGHTS_SINGLE_BUFFER:
        try:
            out = run(True)
        except Exception:
            # This jax build rejects pl.Buffered(1); fall back to default
            # double-buffering (correctness identical, slightly more VMEM).
            _WEIGHTS_SINGLE_BUFFER = False
            out = run(False)
    else:
        out = run(False)

    # Strip row padding and lane padding outside the kernel (cheap XLA slice).
    return out[:N, :d_out]


def init_params(key, input_dim, n_hidden_1, n_hidden_2, out_dim):
    """Deterministic synthetic parameters (uniform like torch Linear default)."""
    ks = jax.random.split(key, 6)

    def linear(kw, kb, fan_in, fan_out):
        bound = 1.0 / jnp.sqrt(float(fan_in))
        w = jax.random.uniform(kw, (fan_in, fan_out), jnp.float32, -bound, bound)
        b = jax.random.uniform(kb, (1, fan_out), jnp.float32, -bound, bound)
        return w, b

    w1, b1 = linear(ks[0], ks[1], input_dim, n_hidden_1)
    gamma = jnp.ones((1, n_hidden_1), jnp.float32)   # LayerNorm weight init
    beta = jnp.zeros((1, n_hidden_1), jnp.float32)   # LayerNorm bias init
    w2, b2 = linear(ks[2], ks[3], n_hidden_1, n_hidden_2)
    w3, b3 = linear(ks[4], ks[5], n_hidden_2, out_dim)
    return (w1, b1, gamma, beta, w2, b2, w3, b3)


def reference_forward(x, params, matmul_dtype=jnp.bfloat16):
    """Pure-JAX reference (eval-mode dropout, same bf16-at-matmul casts)."""
    # NOTE: bf16 MXU operands => ~1e-2-level relative deviation vs a true f32
    # PyTorch module; keep f32 matmuls if exact parity is required.
    w1, b1, gamma, beta, w2, b2, w3, b3 = params
    mm = lambda a, w: jnp.dot(a.astype(matmul_dtype), w.astype(matmul_dtype),
                              preferred_element_type=jnp.float32)
    h = mm(x, w1) + b1
    mu = h.mean(-1, keepdims=True)
    var = ((h - mu) ** 2).mean(-1, keepdims=True)
    h = (h - mu) * jax.lax.rsqrt(var + LN_EPS)
    h = h * gamma + beta
    h = jnp.maximum(h, 0.0)
    h = jnp.maximum(mm(h, w2) + b2, 0.0)
    return mm(h, w3) + b3


if __name__ == "__main__":
    # Small shapes consistent with Prediction(input_dim, n_hidden_1, n_hidden_2, out_dim)
    N, INPUT_DIM, H1, H2, OUT_DIM = 20, 32, 64, 32, 8

    key = jax.random.PRNGKey(0)
    kx, kp = jax.random.split(key)
    x = jax.random.normal(kx, (N, INPUT_DIM), jnp.float32)
    params = init_params(kp, INPUT_DIM, H1, H2, OUT_DIM)
    prepared = prepare_params(params)   # one-time bf16 cast + lane padding

    ref = reference_forward(x, params)

    # Single-block launch (whole N fits in one row tile).
    out = jax.block_until_ready(prediction_forward(x, prepared))
    assert out.shape == (N, OUT_DIM)
    assert jnp.allclose(out, ref, atol=1e-3, rtol=1e-3), "mismatch (single block)"

    # Multi-step row grid (exercises tiling + ragged-tail zero padding).
    out_tiled = jax.block_until_ready(prediction_forward(x, prepared, block_rows=16))
    assert jnp.allclose(out_tiled, ref, atol=1e-3, rtol=1e-3), "mismatch (tiled)"

    # Megacore-style split (>=2 grid steps along the parallel row axis).
    out_mc = jax.block_until_ready(
        prediction_forward(x, prepared, min_grid_steps=2))
    assert jnp.allclose(out_mc, ref, atol=1e-3, rtol=1e-3), "mismatch (min_grid_steps)"

    print("KERNEL_OK")
</pallas_src>

<mosaic_0001>
module attributes {stable_mosaic.version = 11 : i64} {
  func.func @_prediction_kernel(%arg0: i32, %arg1: memref<32x32xf32, #tpu.memory_space<vmem>>, %arg2: memref<32x64xbf16, #tpu.memory_space<vmem>>, %arg3: memref<1x64xf32, #tpu.memory_space<vmem>>, %arg4: memref<1x64xf32, #tpu.memory_space<vmem>>, %arg5: memref<1x64xf32, #tpu.memory_space<vmem>>, %arg6: memref<64x32xbf16, #tpu.memory_space<vmem>>, %arg7: memref<1x32xf32, #tpu.memory_space<vmem>>, %arg8: memref<32x128xbf16, #tpu.memory_space<vmem>>, %arg9: memref<1x128xf32, #tpu.memory_space<vmem>>, %arg10: memref<32x128xf32, #tpu.memory_space<vmem>>) attributes {dimension_semantics = [#tpu.dimension_semantics<parallel>], iteration_bounds = array<i64: 1>, scalar_prefetch = 0 : i64, scratch_operands = 0 : i64, tpu.core_type = #tpu.core_type<tc>, window_params = [{transform_indices = @transform_0, window_bounds = array<i64: 32, 32>}, {pipeline_mode = #tpu.pipeline_mode<synchronous>, transform_indices = @transform_1, window_bounds = array<i64: 32, 64>}, {pipeline_mode = #tpu.pipeline_mode<synchronous>, transform_indices = @transform_2, window_bounds = array<i64: 1, 64>}, {pipeline_mode = #tpu.pipeline_mode<synchronous>, transform_indices = @transform_3, window_bounds = array<i64: 1, 64>}, {pipeline_mode = #tpu.pipeline_mode<synchronous>, transform_indices = @transform_4, window_bounds = array<i64: 1, 64>}, {pipeline_mode = #tpu.pipeline_mode<synchronous>, transform_indices = @transform_5, window_bounds = array<i64: 64, 32>}, {pipeline_mode = #tpu.pipeline_mode<synchronous>, transform_indices = @transform_6, window_bounds = array<i64: 1, 32>}, {pipeline_mode = #tpu.pipeline_mode<synchronous>, transform_indices = @transform_7, window_bounds = array<i64: 32, 128>}, {pipeline_mode = #tpu.pipeline_mode<synchronous>, transform_indices = @transform_8, window_bounds = array<i64: 1, 128>}, {transform_indices = @transform_9, window_bounds = array<i64: 32, 128>}]} {
    %c0 = arith.constant 0 : index
    %c0_0 = arith.constant 0 : index
    %0 = vector.load %arg1[%c0, %c0_0] : memref<32x32xf32, #tpu.memory_space<vmem>>, vector<32x32xf32>
    %1 = arith.truncf %0 : vector<32x32xf32> to vector<32x32xbf16>
    %c0_1 = arith.constant 0 : index
    %c0_2 = arith.constant 0 : index
    %2 = vector.load %arg2[%c0_1, %c0_2] : memref<32x64xbf16, #tpu.memory_space<vmem>>, vector<32x64xbf16>
    %cst = arith.constant dense<0.000000e+00> : vector<32x64xf32>
    %3 = tpu.matmul %1, %2, %cst {dimension_numbers = #tpu.dot_dimension_numbers<[1], [0], [0], [1], [0, 0, 1, 1], [], []>} : vector<32x32xbf16>, vector<32x64xbf16>, vector<32x64xf32> -> vector<32x64xf32>
    %c0_3 = arith.constant 0 : index
    %c0_4 = arith.constant 0 : index
    %4 = vector.load %arg3[%c0_3, %c0_4] : memref<1x64xf32, #tpu.memory_space<vmem>>, vector<1x64xf32>
    %5 = vector.broadcast %4 : vector<1x64xf32> to vector<32x64xf32>
    %6 = arith.addf %3, %5 : vector<32x64xf32>
    %cst_5 = arith.constant dense<0.000000e+00> : vector<32xf32>
    %7 = vector.multi_reduction <add>, %6, %cst_5 [1] : vector<32x64xf32> to vector<32xf32>
    %8 = vector.shape_cast %7 : vector<32xf32> to vector<32x1xf32>
    %cst_6 = arith.constant 6.400000e+01 : f32
    %9 = vector.broadcast %cst_6 : f32 to vector<32x1xf32>
    %10 = arith.divf %8, %9 : vector<32x1xf32>
    %11 = vector.broadcast %10 : vector<32x1xf32> to vector<32x64xf32>
    %12 = arith.subf %6, %11 : vector<32x64xf32>
    %13 = arith.mulf %12, %12 : vector<32x64xf32>
    %cst_7 = arith.constant dense<0.000000e+00> : vector<32xf32>
    %14 = vector.multi_reduction <add>, %13, %cst_7 [1] : vector<32x64xf32> to vector<32xf32>
    %15 = vector.shape_cast %14 : vector<32xf32> to vector<32x1xf32>
    %cst_8 = arith.constant 6.400000e+01 : f32
    %16 = vector.broadcast %cst_8 : f32 to vector<32x1xf32>
    %17 = arith.divf %15, %16 : vector<32x1xf32>
    %cst_9 = arith.constant 9.99999974E-6 : f32
    %18 = vector.broadcast %cst_9 : f32 to vector<32x1xf32>
    %19 = arith.addf %17, %18 : vector<32x1xf32>
    %20 = math.rsqrt %19 : vector<32x1xf32>
    %21 = vector.broadcast %20 : vector<32x1xf32> to vector<32x64xf32>
    %22 = arith.mulf %12, %21 : vector<32x64xf32>
    %c0_10 = arith.constant 0 : index
    %c0_11 = arith.constant 0 : index
    %23 = vector.load %arg4[%c0_10, %c0_11] : memref<1x64xf32, #tpu.memory_space<vmem>>, vector<1x64xf32>
    %24 = vector.broadcast %23 : vector<1x64xf32> to vector<32x64xf32>
    %25 = arith.mulf %22, %24 : vector<32x64xf32>
    %c0_12 = arith.constant 0 : index
    %c0_13 = arith.constant 0 : index
    %26 = vector.load %arg5[%c0_12, %c0_13] : memref<1x64xf32, #tpu.memory_space<vmem>>, vector<1x64xf32>
    %27 = vector.broadcast %26 : vector<1x64xf32> to vector<32x64xf32>
    %28 = arith.addf %25, %27 : vector<32x64xf32>
    %cst_14 = arith.constant 0.000000e+00 : f32
    %29 = vector.broadcast %cst_14 : f32 to vector<32x64xf32>
    %30 = arith.maximumf %28, %29 : vector<32x64xf32>
    %31 = arith.truncf %30 : vector<32x64xf32> to vector<32x64xbf16>
    %c0_15 = arith.constant 0 : index
    %c0_16 = arith.constant 0 : index
    %32 = vector.load %arg6[%c0_15, %c0_16] : memref<64x32xbf16, #tpu.memory_space<vmem>>, vector<64x32xbf16>
    %cst_17 = arith.constant dense<0.000000e+00> : vector<32x32xf32>
    %33 = tpu.matmul %31, %32, %cst_17 {dimension_numbers = #tpu.dot_dimension_numbers<[1], [0], [0], [1], [0, 0, 1, 1], [], []>} : vector<32x64xbf16>, vector<64x32xbf16>, vector<32x32xf32> -> vector<32x32xf32>
    %c0_18 = arith.constant 0 : index
    %c0_19 = arith.constant 0 : index
    %34 = vector.load %arg7[%c0_18, %c0_19] : memref<1x32xf32, #tpu.memory_space<vmem>>, vector<1x32xf32>
    %35 = vector.broadcast %34 : vector<1x32xf32> to vector<32x32xf32>
    %36 = arith.addf %33, %35 : vector<32x32xf32>
    %cst_20 = arith.constant 0.000000e+00 : f32
    %37 = vector.broadcast %cst_20 : f32 to vector<32x32xf32>
    %38 = arith.maximumf %36, %37 : vector<32x32xf32>
    %39 = arith.truncf %38 : vector<32x32xf32> to vector<32x32xbf16>
    %c0_21 = arith.constant 0 : index
    %c0_22 = arith.constant 0 : index
    %40 = vector.load %arg8[%c0_21, %c0_22] : memref<32x128xbf16, #tpu.memory_space<vmem>>, vector<32x128xbf16>
    %cst_23 = arith.constant dense<0.000000e+00> : vector<32x128xf32>
    %41 = tpu.matmul %39, %40, %cst_23 {dimension_numbers = #tpu.dot_dimension_numbers<[1], [0], [0], [1], [0, 0, 1, 1], [], []>} : vector<32x32xbf16>, vector<32x128xbf16>, vector<32x128xf32> -> vector<32x128xf32>
    %c0_24 = arith.constant 0 : index
    %c0_25 = arith.constant 0 : index
    %42 = vector.load %arg9[%c0_24, %c0_25] : memref<1x128xf32, #tpu.memory_space<vmem>>, vector<1x128xf32>
    %43 = vector.broadcast %42 : vector<1x128xf32> to vector<32x128xf32>
    %44 = arith.addf %41, %43 : vector<32x128xf32>
    %c0_26 = arith.constant 0 : index
    %c0_27 = arith.constant 0 : index
    %45 = vector.load %arg10[%c0_26, %c0_27] : memref<32x128xf32, #tpu.memory_space<vmem>>, vector<32x128xf32>
    tpu.vector_store %arg10[%c0_26, %c0_27], %44 {strides = array<i32>} : memref<32x128xf32, #tpu.memory_space<vmem>>, vector<32x128xf32>,
    return
  }
  func.func @transform_0(%arg0: i32) -> (i32, i32) {
    %c0_i32 = arith.constant 0 : i32
    %c0_i32_0 = arith.constant 0 : i32
    return %arg0, %c0_i32 : i32, i32
  }
  func.func @transform_1(%arg0: i32) -> (i32, i32) {
    %c0_i32 = arith.constant 0 : i32
    %c0_i32_0 = arith.constant 0 : i32
    %c0_i32_1 = arith.constant 0 : i32
    return %c0_i32, %c0_i32_0 : i32, i32
  }
  func.func @transform_2(%arg0: i32) -> (i32, i32) {
    %c0_i32 = arith.constant 0 : i32
    %c0_i32_0 = arith.constant 0 : i32
    %c0_i32_1 = arith.constant 0 : i32
    return %c0_i32, %c0_i32_0 : i32, i32
  }
  func.func @transform_3(%arg0: i32) -> (i32, i32) {
    %c0_i32 = arith.constant 0 : i32
    %c0_i32_0 = arith.constant 0 : i32
    %c0_i32_1 = arith.constant 0 : i32
    return %c0_i32, %c0_i32_0 : i32, i32
  }
  func.func @transform_4(%arg0: i32) -> (i32, i32) {
    %c0_i32 = arith.constant 0 : i32
    %c0_i32_0 = arith.constant 0 : i32
    %c0_i32_1 = arith.constant 0 : i32
    return %c0_i32, %c0_i32_0 : i32, i32
  }
  func.func @transform_5(%arg0: i32) -> (i32, i32) {
    %c0_i32 = arith.constant 0 : i32
    %c0_i32_0 = arith.constant 0 : i32
    %c0_i32_1 = arith.constant 0 : i32
    return %c0_i32, %c0_i32_0 : i32, i32
  }
  func.func @transform_6(%arg0: i32) -> (i32, i32) {
    %c0_i32 = arith.constant 0 : i32
    %c0_i32_0 = arith.constant 0 : i32
    %c0_i32_1 = arith.constant 0 : i32
    return %c0_i32, %c0_i32_0 : i32, i32
  }
  func.func @transform_7(%arg0: i32) -> (i32, i32) {
    %c0_i32 = arith.constant 0 : i32
    %c0_i32_0 = arith.constant 0 : i32
    %c0_i32_1 = arith.constant 0 : i32
    return %c0_i32, %c0_i32_0 : i32, i32
  }
  func.func @transform_8(%arg0: i32) -> (i32, i32) {
    %c0_i32 = arith.constant 0 : i32
    %c0_i32_0 = arith.constant 0 : i32
    %c0_i32_1 = arith.constant 0 : i32
    return %c0_i32, %c0_i32_0 : i32, i32
  }
  func.func @transform_9(%arg0: i32) -> (i32, i32) {
    %c0_i32 = arith.constant 0 : i32
    %c0_i32_0 = arith.constant 0 : i32
    return %arg0, %c0_i32 : i32, i32
  }
}

module attributes {stable_mosaic.version = 11 : i64} {
  func.func @_prediction_kernel(%arg0: i32, %arg1: memref<32x32xf32, #tpu.memory_space<vmem>>, %arg2: memref<32x64xbf16, #tpu.memory_space<vmem>>, %arg3: memref<1x64xf32, #tpu.memory_space<vmem>>, %arg4: memref<1x64xf32, #tpu.memory_space<vmem>>, %arg5: memref<1x64xf32, #tpu.memory_space<vmem>>, %arg6: memref<64x32xbf16, #tpu.memory_space<vmem>>, %arg7: memref<1x32xf32, #tpu.memory_space<vmem>>, %arg8: memref<32x128xbf16, #tpu.memory_space<vmem>>, %arg9: memref<1x128xf32, #tpu.memory_space<vmem>>, %arg10: memref<32x128xf32, #tpu.memory_space<vmem>>) attributes {dimension_semantics = [#tpu.dimension_semantics<parallel>], iteration_bounds = array<i64: 1>, scalar_prefetch = 0 : i64, scratch_operands = 0 : i64, tpu.core_type = #tpu.core_type<tc>, window_params = [{transform_indices = @transform_0, window_bounds = array<i64: 32, 32>}, {pipeline_mode = #tpu.pipeline_mode<synchronous>, transform_indices = @transform_1, window_bounds = array<i64: 32, 64>}, {pipeline_mode = #tpu.pipeline_mode<synchronous>, transform_indices = @transform_2, window_bounds = array<i64: 1, 64>}, {pipeline_mode = #tpu.pipeline_mode<synchronous>, transform_indices = @transform_3, window_bounds = array<i64: 1, 64>}, {pipeline_mode = #tpu.pipeline_mode<synchronous>, transform_indices = @transform_4, window_bounds = array<i64: 1, 64>}, {pipeline_mode = #tpu.pipeline_mode<synchronous>, transform_indices = @transform_5, window_bounds = array<i64: 64, 32>}, {pipeline_mode = #tpu.pipeline_mode<synchronous>, transform_indices = @transform_6, window_bounds = array<i64: 1, 32>}, {pipeline_mode = #tpu.pipeline_mode<synchronous>, transform_indices = @transform_7, window_bounds = array<i64: 32, 128>}, {pipeline_mode = #tpu.pipeline_mode<synchronous>, transform_indices = @transform_8, window_bounds = array<i64: 1, 128>}, {transform_indices = @transform_9, window_bounds = array<i64: 32, 128>}]} {
    %c0 = arith.constant 0 : index
    %c0_0 = arith.constant 0 : index
    %0 = vector.load %arg1[%c0, %c0_0] : memref<32x32xf32, #tpu.memory_space<vmem>>, vector<32x32xf32>
    %1 = arith.truncf %0 : vector<32x32xf32> to vector<32x32xbf16>
    %c0_1 = arith.constant 0 : index
    %c0_2 = arith.constant 0 : index
    %2 = vector.load %arg2[%c0_1, %c0_2] : memref<32x64xbf16, #tpu.memory_space<vmem>>, vector<32x64xbf16>
    %cst = arith.constant dense<0.000000e+00> : vector<32x64xf32>
    %3 = tpu.matmul %1, %2, %cst {dimension_numbers = #tpu.dot_dimension_numbers<[1], [0], [0], [1], [0, 0, 1, 1], [], []>} : vector<32x32xbf16>, vector<32x64xbf16>, vector<32x64xf32> -> vector<32x64xf32>
    %c0_3 = arith.constant 0 : index
    %c0_4 = arith.constant 0 : index
    %4 = vector.load %arg3[%c0_3, %c0_4] : memref<1x64xf32, #tpu.memory_space<vmem>>, vector<1x64xf32>
    %5 = vector.broadcast %4 : vector<1x64xf32> to vector<32x64xf32>
    %6 = arith.addf %3, %5 : vector<32x64xf32>
    %cst_5 = arith.constant dense<0.000000e+00> : vector<32xf32>
    %7 = vector.multi_reduction <add>, %6, %cst_5 [1] : vector<32x64xf32> to vector<32xf32>
    %8 = vector.shape_cast %7 : vector<32xf32> to vector<32x1xf32>
    %cst_6 = arith.constant 6.400000e+01 : f32
    %9 = vector.broadcast %cst_6 : f32 to vector<32x1xf32>
    %10 = arith.divf %8, %9 : vector<32x1xf32>
    %11 = vector.broadcast %10 : vector<32x1xf32> to vector<32x64xf32>
    %12 = arith.subf %6, %11 : vector<32x64xf32>
    %13 = arith.mulf %12, %12 : vector<32x64xf32>
    %cst_7 = arith.constant dense<0.000000e+00> : vector<32xf32>
    %14 = vector.multi_reduction <add>, %13, %cst_7 [1] : vector<32x64xf32> to vector<32xf32>
    %15 = vector.shape_cast %14 : vector<32xf32> to vector<32x1xf32>
    %cst_8 = arith.constant 6.400000e+01 : f32
    %16 = vector.broadcast %cst_8 : f32 to vector<32x1xf32>
    %17 = arith.divf %15, %16 : vector<32x1xf32>
    %cst_9 = arith.constant 9.99999974E-6 : f32
    %18 = vector.broadcast %cst_9 : f32 to vector<32x1xf32>
    %19 = arith.addf %17, %18 : vector<32x1xf32>
    %20 = math.rsqrt %19 : vector<32x1xf32>
    %21 = vector.broadcast %20 : vector<32x1xf32> to vector<32x64xf32>
    %22 = arith.mulf %12, %21 : vector<32x64xf32>
    %c0_10 = arith.constant 0 : index
    %c0_11 = arith.constant 0 : index
    %23 = vector.load %arg4[%c0_10, %c0_11] : memref<1x64xf32, #tpu.memory_space<vmem>>, vector<1x64xf32>
    %24 = vector.broadcast %23 : vector<1x64xf32> to vector<32x64xf32>
    %25 = arith.mulf %22, %24 : vector<32x64xf32>
    %c0_12 = arith.constant 0 : index
    %c0_13 = arith.constant 0 : index
    %26 = vector.load %arg5[%c0_12, %c0_13] : memref<1x64xf32, #tpu.memory_space<vmem>>, vector<1x64xf32>
    %27 = vector.broadcast %26 : vector<1x64xf32> to vector<32x64xf32>
    %28 = arith.addf %25, %27 : vector<32x64xf32>
    %cst_14 = arith.constant 0.000000e+00 : f32
    %29 = vector.broadcast %cst_14 : f32 to vector<32x64xf32>
    %30 = arith.maximumf %28, %29 : vector<32x64xf32>
    %31 = arith.truncf %30 : vector<32x64xf32> to vector<32x64xbf16>
    %c0_15 = arith.constant 0 : index
    %c0_16 = arith.constant 0 : index
    %32 = vector.load %arg6[%c0_15, %c0_16] : memref<64x32xbf16, #tpu.memory_space<vmem>>, vector<64x32xbf16>
    %cst_17 = arith.constant dense<0.000000e+00> : vector<32x32xf32>
    %33 = tpu.matmul %31, %32, %cst_17 {dimension_numbers = #tpu.dot_dimension_numbers<[1], [0], [0], [1], [0, 0, 1, 1], [], []>} : vector<32x64xbf16>, vector<64x32xbf16>, vector<32x32xf32> -> vector<32x32xf32>
    %c0_18 = arith.constant 0 : index
    %c0_19 = arith.constant 0 : index
    %34 = vector.load %arg7[%c0_18, %c0_19] : memref<1x32xf32, #tpu.memory_space<vmem>>, vector<1x32xf32>
    %35 = vector.broadcast %34 : vector<1x32xf32> to vector<32x32xf32>
    %36 = arith.addf %33, %35 : vector<32x32xf32>
    %cst_20 = arith.constant 0.000000e+00 : f32
    %37 = vector.broadcast %cst_20 : f32 to vector<32x32xf32>
    %38 = arith.maximumf %36, %37 : vector<32x32xf32>
    %39 = arith.truncf %38 : vector<32x32xf32> to vector<32x32xbf16>
    %c0_21 = arith.constant 0 : index
    %c0_22 = arith.constant 0 : index
    %40 = vector.load %arg8[%c0_21, %c0_22] : memref<32x128xbf16, #tpu.memory_space<vmem>>, vector<32x128xbf16>
    %cst_23 = arith.constant dense<0.000000e+00> : vector<32x128xf32>
    %41 = tpu.matmul %39, %40, %cst_23 {dimension_numbers = #tpu.dot_dimension_numbers<[1], [0], [0], [1], [0, 0, 1, 1], [], []>} : vector<32x32xbf16>, vector<32x128xbf16>, vector<32x128xf32> -> vector<32x128xf32>
    %c0_24 = arith.constant 0 : index
    %c0_25 = arith.constant 0 : index
    %42 = vector.load %arg9[%c0_24, %c0_25] : memref<1x128xf32, #tpu.memory_space<vmem>>, vector<1x128xf32>
    %43 = vector.broadcast %42 : vector<1x128xf32> to vector<32x128xf32>
    %44 = arith.addf %41, %43 : vector<32x128xf32>
    %c0_26 = arith.constant 0 : index
    %c0_27 = arith.constant 0 : index
    %45 = vector.load %arg10[%c0_26, %c0_27] : memref<32x128xf32, #tpu.memory_space<vmem>>, vector<32x128xf32>
    tpu.vector_store %arg10[%c0_26, %c0_27], %44 {strides = array<i32>} : memref<32x128xf32, #tpu.memory_space<vmem>>, vector<32x128xf32>,
    return
  }
  func.func @transform_0(%arg0: i32) -> (i32, i32) {
    %c0_i32 = arith.constant 0 : i32
    %c0_i32_0 = arith.constant 0 : i32
    return %arg0, %c0_i32 : i32, i32
  }
  func.func @transform_1(%arg0: i32) -> (i32, i32) {
    %c0_i32 = arith.constant 0 : i32
    %c0_i32_0 = arith.constant 0 : i32
    %c0_i32_1 = arith.constant 0 : i32
    return %c0_i32, %c0_i32_0 : i32, i32
  }
  func.func @transform_2(%arg0: i32) -> (i32, i32) {
    %c0_i32 = arith.constant 0 : i32
    %c0_i32_0 = arith.constant 0 : i32
    %c0_i32_1 = arith.constant 0 : i32
    return %c0_i32, %c0_i32_0 : i32, i32
  }
  func.func @transform_3(%arg0: i32) -> (i32, i32) {
    %c0_i32 = arith.constant 0 : i32
    %c0_i32_0 = arith.constant 0 : i32
    %c0_i32_1 = arith.constant 0 : i32
    return %c0_i32, %c0_i32_0 : i32, i32
  }
  func.func @transform_4(%arg0: i32) -> (i32, i32) {
    %c0_i32 = arith.constant 0 : i32
    %c0_i32_0 = arith.constant 0 : i32
    %c0_i32_1 = arith.constant 0 : i32
    return %c0_i32, %c0_i32_0 : i32, i32
  }
  func.func @transform_5(%arg0: i32) -> (i32, i32) {
    %c0_i32 = arith.constant 0 : i32
    %c0_i32_0 = arith.constant 0 : i32
    %c0_i32_1 = arith.constant 0 : i32
    return %c0_i32, %c0_i32_0 : i32, i32
  }
  func.func @transform_6(%arg0: i32) -> (i32, i32) {
    %c0_i32 = arith.constant 0 : i32
    %c0_i32_0 = arith.constant 0 : i32
    %c0_i32_1 = arith.constant 0 : i32
    return %c0_i32, %c0_i32_0 : i32, i32
  }
  func.func @transform_7(%arg0: i32) -> (i32, i32) {
    %c0_i32 = arith.constant 0 : i32
    %c0_i32_0 = arith.constant 0 : i32
    %c0_i32_1 = arith.constant 0 : i32
    return %c0_i32, %c0_i32_0 : i32, i32
  }
  func.func @transform_8(%arg0: i32) -> (i32, i32) {
    %c0_i32 = arith.constant 0 : i32
    %c0_i32_0 = arith.constant 0 : i32
    %c0_i32_1 = arith.constant 0 : i32
    return %c0_i32, %c0_i32_0 : i32, i32
  }
  func.func @transform_9(%arg0: i32) -> (i32, i32) {
    %c0_i32 = arith.constant 0 : i32
    %c0_i32_0 = arith.constant 0 : i32
    return %arg0, %c0_i32 : i32, i32
  }
}

</mosaic_0001>

<bundles_post_ra>
// kernel: tpu_custom_call.1
= control target key start
LH: loop header
LB: loop body
LE: loop exit
PB: predicated region body
PF: predicated region fallthrough
CT: control target
= control target key end

     0   :  { %14 = vsyncpa [#allocation3], 0  ;;  %s662_s0 = inlined_call_operand.vmem [shape: f32[32,32], index: 0, kind: input, shape index: {}]   ;;  %s663_s1 = inlined_call_operand.vmem [shape: bf16[32,64], index: 1, kind: input, shape index: {}]   ;;  %s664_s2 = inlined_call_operand.vmem [shape: f32[1,64], index: 2, kind: input, shape index: {}]   ;;  %s665_s3 = inlined_call_operand.vmem [shape: f32[1,64], index: 3, kind: input, shape index: {}]   ;;  %s666_s4 = inlined_call_operand.vmem [shape: f32[1,64], index: 4, kind: input, shape index: {}]   ;;  %s667_s5 = inlined_call_operand.vmem [shape: bf16[64,32], index: 5, kind: input, shape index: {}]   ;;  %s668_s6 = inlined_call_operand.vmem [shape: f32[1,32], index: 6, kind: input, shape index: {}]   ;;  %s669_s7 = inlined_call_operand.hbm [shape: bf16[32,128], index: 7, kind: input, shape index: {}]   ;;  %s670_s8 = inlined_call_operand.vmem [shape: f32[1,128], index: 8, kind: input, shape index: {}]   ;;  %s671_s9 = inlined_call_operand.hbm [shape: f32[32,128], index: 9, kind: output, shape index: {}]  }
   0x1   :  { %15 = vsyncpa [#allocation4], 0  ;;  %s541_s30 = smov [#allocation2]  }
   0x2   :  { %s35_s10 = sshll.u32 %s541_s30, 4  ;;  %s36_s10 = int_to_ptr.vmem [resolvable:$true] %s35_s10 }
   0x3   :  { %s505_s11 = scalar_lea.vmem %s36_s10, 256  ;;  %p510_p1 = scmp.lt.s32.totalorder %s36_s10, %s36_s10 }
   0x4   :  { %p506_p0 = scmp.ne.s32.totalorder %s36_s10, %s505_s11  ;;  %p511_p2 = scmp.lt.s32.totalorder %s505_s11, %s505_s11 }
   0x6   :  { %p512_p3 = por %p511_p2, %p510_p1 }
   0x8   :  { %p513_p4 = pnand %p512_p3, %p506_p0 }
   0xa   :  { %516 = shalt.err (!%p513_p4)
}
   0xb   :  { %s542_s12 = smov 64   ;;  %s543_s13 = smov 4  }
   0xc   :  { %41 = dma.hbm_to_vmem [thread:$0]  %s669_s7, 256, %s36_s10, [#allocation3], %s542_s12, %s542_s12, %s543_s13  }
   0xd   :  { %537 = dma.done.wait [#allocation3], 256  }
   0xe   :  { %538 = vsyncadd [#allocation3], 4294967040  ;;  %v481_v0 = vld [vmem:[%s663_s1 + $0x8] sm:$0xff]   ;;  %v482_v1 = vld [vmem:[%s663_s1] sm:$0xff]   ;;  %vm77_vm0 = vcmask 261120   ;;  %vm133_vm1 = vcmask 523264  }
   0xf   :  { %447 = vmatprep.subr.bf16.mxu0 %v481_v0  ;;  %v48_v2 = vld [vmem:[%s662_s0] sm:$0xff]  ;;  %v49_v3 = vld [vmem:[%s662_s0 + $0x8] sm:$0xff]  ;;  %v50_v4 = vld [vmem:[%s662_s0 + $0x10] sm:$0xff] }
  0x10   :  { %448 = vmatpush3.bf16.msra.mxu0 %v481_v0  ;;  %v52_v5 = vpack.c.bf16 %v49_v3, %v48_v2  ;;  %v51_v6 = vld [vmem:[%s662_s0 + $0x18] sm:$0xff]  ;;  %v414_v8 = vld [vmem:[%s664_s2] ss:$0 sm:$0xff]  ;;  %v484_v42 = vld [vmem:[%s667_s5 + $0x10] sm:$0xff]  }
  0x11   :  { %449 = vmatprep.subr.bf16.mxu0 %v482_v1  ;;  %v53_v7 = vpack.c.bf16 %v51_v6, %v50_v4  ;;  %v483_v41 = vld [vmem:[%s667_s5 + $0x18] sm:$0xff]   ;;  %v485_v43 = vld [vmem:[%s667_s5 + $0x8] sm:$0xff]   ;;  %v486_v44 = vld [vmem:[%s667_s5] sm:$0xff]  }
  0x12   :  { %451 = vmatprep.mubr.msk.bf16.mxu0 %vm77_vm0, %v52_v5  ;;  %455 = vmatprep.subr.bf16.mxu1 %v483_v41  ;;  %v419_v58 = vld [vmem:[%s665_s3] ss:$0 sm:$0xff] }
  0x13   :  { %456 = vmatpush3.bf16.msra.mxu1 %v483_v41  ;;  %v420_v62 = vld [vmem:[%s666_s4] ss:$0 sm:$0xff] }
  0x14   :  { %450 = vmatpush3.bf16.msra.mxu0 %v482_v1  ;;  %457 = vmatprep.subr.bf16.mxu1 %v484_v42 }
  0x17   :  { %452 = vmatmul.mubr.msk.bf16.vlgmr.msra.gmra.mxu0 %vm77_vm0, %v53_v7  ;;  %458 = vmatpush3.bf16.msra.mxu1 %v484_v42 }
  0x18   :  { %459 = vmatprep.subr.bf16.mxu1 %v485_v43 }
  0x1b   :  { %460 = vmatpush3.bf16.msra.mxu1 %v485_v43 }
  0x1c   :  { %461 = vmatprep.subr.bf16.mxu1 %v486_v44 }
  0x1f   :  { %462 = vmatpush3.bf16.msra.mxu1 %v486_v44 }
  0xd7   :  { %v453_v9 = vpop.f32.mrf.mxu0 }
  0xd8   :  { %v127_v10 = vadd.f32 %v453_v9, %v414_v8 }
  0xd9   :  { %v118_v11 = vpop.f32.mrf.mxu0 }
  0xda   :  { %v119_v12 = vadd.f32 %v414_v8, %v118_v11  ;;  %v140_v13 = vsel %vm133_vm1, %v127_v10, 0.0 }
  0xdb   :  { %141 = vadd.xlane.f32.xlu1 %v140_v13  ;;  %v454_v14 = vpop.f32.mrf.mxu0 }
  0xdc   :  { %v130_v15 = vadd.f32 %v454_v14, %v414_v8  ;;  %v134_v16 = vsel %vm133_vm1, %v119_v12, 0.0 }
  0xdd   :  { %v121_v17 = vpop.f32.mrf.mxu0  ;;  %135 = vadd.xlane.f32.xlu0 %v134_v16 }
  0xde   :  { %v122_v18 = vadd.f32 %v414_v8, %v121_v17  ;;  %v143_v19 = vsel %vm133_vm1, %v130_v15, 0.0  ;;  %v487_v17 = vld [vmem:[#allocation2 + $0x8] sm:$0xff]  }
  0xdf   :  { %144 = vadd.xlane.f32.xlu1 %v143_v19  ;;  %467 = vmatprep.subr.bf16.mxu0 %v487_v17 }
  0xe0   :  { %v137_v20 = vsel %vm133_vm1, %v122_v18, 0.0  ;;  %468 = vmatpush3.bf16.msra.mxu0 %v487_v17 }
  0xe1   :  { %138 = vadd.xlane.f32.xlu0 %v137_v20 }
 0x164   :  { %v142_v21 = vpop.xlane.xlu1 %141 }
 0x165   :  { %v149_v22 = vmul.f32 0.015625, %v142_v21  ;;  %v421_v21 = vld [vmem:[%s668_s6] ss:$0 sm:$0xff]  ;;  %s544_s6 = smov [#allocation5]  }
 0x166   :  { %v136_v23 = vpop.xlane.xlu0 %135  ;;  %s402_s18 = sshll.u32 %s544_s6, 4  ;;  %s403_s18 = int_to_ptr.vmem [resolvable:$true] %s402_s18 }
 0x167   :  { %v147_v24 = vmul.f32 0.015625, %v136_v23  ;;  %v153_v26 = vsub.f32 %v127_v10, %v149_v22  ;;  %s517_s19 = scalar_lea.vmem %s403_s18, 512  ;;  %p522_p6 = scmp.lt.s32.totalorder %s403_s18, %s403_s18 }
 0x168   :  { %v145_v25 = vpop.xlane.xlu1 %144  ;;  %p518_p5 = scmp.ne.s32.totalorder %s403_s18, %s517_s19  ;;  %p523_p7 = scmp.lt.s32.totalorder %s517_s19, %s517_s19 }
 0x169   :  { %v151_v27 = vsub.f32 %v119_v12, %v147_v24  ;;  %v150_v28 = vmul.f32 0.015625, %v145_v25  ;;  %v157_v35 = vmul.f32 %v153_v26, %v153_v26 }
 0x16a   :  { %v139_v29 = vpop.xlane.xlu0 %138  ;;  %p524_p8 = por %p523_p7, %p522_p6 }
 0x16b   :  { %v148_v30 = vmul.f32 0.015625, %v139_v29  ;;  %v155_v31 = vmul.f32 %v151_v27, %v151_v27  ;;  %v154_v32 = vsub.f32 %v130_v15, %v150_v28  ;;  %v165_v37 = vsel %vm133_vm1, %v157_v35, 0.0 }
 0x16c   :  { %p525_p9 = pnand %p524_p8, %p518_p5 }
 0x16d   :  { %v152_v33 = vsub.f32 %v122_v18, %v148_v30  ;;  %v159_v34 = vsel %vm133_vm1, %v155_v31, 0.0  ;;  %v158_v39 = vmul.f32 %v154_v32, %v154_v32  ;;  %v488_v18 = vld [vmem:[#allocation2] sm:$0xff]  }
 0x16e   :  { %160 = vadd.xlane.f32.xlu0 %v159_v34  ;;  %469 = vmatprep.subr.bf16.mxu0 %v488_v18  ;;  %v428_v34 = vld [vmem:[%s670_s8] ss:$0 sm:$0xff] }
 0x16f   :  { %v156_v36 = vmul.f32 %v152_v33, %v152_v33  ;;  %v168_v40 = vsel %vm133_vm1, %v158_v39, 0.0  ;;  %470 = vmatpush3.bf16.msra.mxu0 %v488_v18 }
 0x171   :  { %v162_v38 = vsel %vm133_vm1, %v156_v36, 0.0 }
 0x172   :  { %166 = vadd.xlane.f32.xlu0 %v165_v37  ;;  %163 = vadd.xlane.f32.xlu1 %v162_v38 }
 0x176   :  { %169 = vadd.xlane.f32.xlu1 %v168_v40 }
 0x1f7   :  { %v161_v45 = vpop.xlane.xlu0 %160 }
 0x1f8   :  { %v171_v46 = vmul.f32 0.015625, %v161_v45 }
 0x1fa   :  { %v175_v47 = vadd.f32 1e-05, %v171_v46 }
 0x1fb   :  { %v164_v48 = vpop.xlane.xlu1 %163  ;;  %v167_v49 = vpop.xlane.xlu0 %166 }
 0x1fc   :  { %489 = vrsqrt.f32 %v175_v47  ;;  %v172_v50 = vmul.f32 0.015625, %v164_v48  ;;  %v173_v51 = vmul.f32 0.015625, %v167_v49 }
 0x1fe   :  { %v176_v52 = vadd.f32 1e-05, %v172_v50  ;;  %v177_v53 = vadd.f32 1e-05, %v173_v51 }
 0x1ff   :  { %v170_v54 = vpop.xlane.xlu1 %169 }
 0x200   :  { %491 = vrsqrt.f32 %v176_v52  ;;  %v174_v55 = vmul.f32 0.015625, %v170_v54 }
 0x201   :  { %493 = vrsqrt.f32 %v177_v53 }
 0x202   :  { %v178_v56 = vadd.f32 1e-05, %v174_v55 }
 0x204   :  { %495 = vrsqrt.f32 %v178_v56 }
 0x209   :  { %v490_v57 = vpop.eup %489 }
 0x20a   :  { %v183_v59 = vmul.f32 %v490_v57, %v151_v27 }
 0x20c   :  { %v194_v60 = vmul.f32 %v419_v58, %v183_v59 }
 0x20d   :  { %v492_v61 = vpop.eup %491 }
 0x20e   :  { %v494_v63 = vpop.eup %493  ;;  %v184_v0 = vmul.f32 %v492_v61, %v152_v33  ;;  %v205_v3 = vadd.f32 %v420_v62, %v194_v60 }
 0x20f   :  { %v185_v1 = vmul.f32 %v494_v63, %v153_v26 }
 0x210   :  { %v195_v2 = vmul.f32 %v419_v58, %v184_v0  ;;  %v209_v8 = vmax.f32 %v205_v3, 0.0 }
 0x211   :  { %v496_v4 = vpop.eup %495  ;;  %v196_v5 = vmul.f32 %v419_v58, %v185_v1 }
 0x212   :  { %v206_v6 = vadd.f32 %v420_v62, %v195_v2  ;;  %v186_v7 = vmul.f32 %v496_v4, %v154_v32 }
 0x213   :  { %v207_v11 = vadd.f32 %v420_v62, %v196_v5 }
 0x214   :  { %v210_v9 = vmax.f32 %v206_v6, 0.0  ;;  %v197_v10 = vmul.f32 %v419_v58, %v186_v7 }
 0x215   :  { %v211_v14 = vmax.f32 %v207_v11, 0.0 }
 0x216   :  { %v213_v12 = vpack.c.bf16 %v210_v9, %v209_v8  ;;  %v208_v13 = vadd.f32 %v420_v62, %v197_v10 }
 0x218   :  { %463 = vmatprep.mubr.msk.bf16.mxu1 %vm133_vm1, %v213_v12  ;;  %v212_v15 = vmax.f32 %v208_v13, 0.0 }
 0x21a   :  { %v214_v16 = vpack.c.bf16 %v212_v15, %v211_v14 }
 0x21c   :  { %464 = vmatmul.mubr.msk.bf16.vlgmr.msra.gmra.mxu1 %vm133_vm1, %v214_v16 }
 0x2dc   :  { %v465_v19 = vpop.f32.mrf.mxu1 }
 0x2dd   :  { %v303_v25 = vadd.f32 %v465_v19, %v421_v21 }
 0x2de   :  { %v294_v20 = vpop.f32.mrf.mxu1 }
 0x2df   :  { %v295_v23 = vadd.f32 %v421_v21, %v294_v20  ;;  %v311_v31 = vmax.f32 %v303_v25, 0.0 }
 0x2e0   :  { %v466_v22 = vpop.f32.mrf.mxu1 }
 0x2e1   :  { %v306_v24 = vadd.f32 %v466_v22, %v421_v21  ;;  %v309_v29 = vmax.f32 %v295_v23, 0.0 }
 0x2e2   :  { %v297_v26 = vpop.f32.mrf.mxu1 }
 0x2e3   :  { %v298_v27 = vadd.f32 %v421_v21, %v297_v26  ;;  %v312_v28 = vmax.f32 %v306_v24, 0.0 }
 0x2e5   :  { %v310_v30 = vmax.f32 %v298_v27, 0.0  ;;  %v314_v33 = vpack.c.bf16 %v312_v28, %v311_v31 }
 0x2e7   :  { %v313_v32 = vpack.c.bf16 %v310_v30, %v309_v29 }
 0x2e9   :  { %471 = vmatprep.mubr.msk.bf16.mxu0 %vm77_vm0, %v313_v32 }
 0x2ea   :  { %472 = vmatmul.mubr.msk.bf16.vlgmr.msra.gmra.mxu0 %vm77_vm0, %v314_v33 }
 0x3aa   :  { %v473_v35 = vpop.f32.mrf.mxu0 }
 0x3ab   :  { %v387_v36 = vadd.f32 %v473_v35, %v428_v34 }
 0x3ac   :  { %v378_v37 = vpop.f32.mrf.mxu0 }
 0x3ad   :  { %395 = vst [vmem:[#allocation5 + $0x10] sm:$0xff] %v387_v36  ;;  %v379_v38 = vadd.f32 %v428_v34, %v378_v37 }
 0x3ae   :  { %v474_v39 = vpop.f32.mrf.mxu0 }
 0x3af   :  { %393 = vst [vmem:[#allocation5] sm:$0xff] %v379_v38  ;;  %v390_v40 = vadd.f32 %v474_v39, %v428_v34 }
 0x3b0   :  { %v381_v41 = vpop.f32.mrf.mxu0 }
 0x3b1   :  { %396 = vst [vmem:[#allocation5 + $0x18] sm:$0xff] %v390_v40  ;;  %v382_v42 = vadd.f32 %v428_v34, %v381_v41 }
 0x3b3   :  { %394 = vst [vmem:[#allocation5 + $0x8] sm:$0xff] %v382_v42 }
 0x3b4   :  { %528 = shalt.err (!%p525_p9)
}
 0x3b5   :  { %s545_s8 = smov 128   ;;  %s546_s20 = smov 8  }
 0x3b6   :  { %408 = dma.vmem_to_hbm [thread:$0]  %s403_s18, 512, %s671_s9, [#allocation4], %s545_s8, %s545_s8, %s546_s20  }
 0x3b7   :  { %539 = dma.done.wait [#allocation4], 512  }
 0x3b8   :  { %540 = vsyncadd [#allocation4], 4294966784 }
 0x3b9   :  { %412 = vsyncpa [#allocation3], 1 }
 0x3ba   :  { %413 = vsyncpa [#allocation4], 1 }

// kernel: tpu_custom_call.1
= control target key start
LH: loop header
LB: loop body
LE: loop exit
PB: predicated region body
PF: predicated region fallthrough
CT: control target
= control target key end

     0   :  { %14 = vsyncpa [#allocation3], 0  ;;  %s662_s0 = inlined_call_operand.vmem [shape: f32[32,32], index: 0, kind: input, shape index: {}]   ;;  %s663_s1 = inlined_call_operand.vmem [shape: bf16[32,64], index: 1, kind: input, shape index: {}]   ;;  %s664_s2 = inlined_call_operand.vmem [shape: f32[1,64], index: 2, kind: input, shape index: {}]   ;;  %s665_s3 = inlined_call_operand.vmem [shape: f32[1,64], index: 3, kind: input, shape index: {}]   ;;  %s666_s4 = inlined_call_operand.vmem [shape: f32[1,64], index: 4, kind: input, shape index: {}]   ;;  %s667_s5 = inlined_call_operand.vmem [shape: bf16[64,32], index: 5, kind: input, shape index: {}]   ;;  %s668_s6 = inlined_call_operand.vmem [shape: f32[1,32], index: 6, kind: input, shape index: {}]   ;;  %s669_s7 = inlined_call_operand.hbm [shape: bf16[32,128], index: 7, kind: input, shape index: {}]   ;;  %s670_s8 = inlined_call_operand.vmem [shape: f32[1,128], index: 8, kind: input, shape index: {}]   ;;  %s671_s9 = inlined_call_operand.hbm [shape: f32[32,128], index: 9, kind: output, shape index: {}]  }
   0x1   :  { %15 = vsyncpa [#allocation4], 0  ;;  %s541_s30 = smov [#allocation2]  }
   0x2   :  { %s35_s10 = sshll.u32 %s541_s30, 4  ;;  %s36_s10 = int_to_ptr.vmem [resolvable:$true] %s35_s10 }
   0x3   :  { %s505_s11 = scalar_lea.vmem %s36_s10, 256  ;;  %p510_p1 = scmp.lt.s32.totalorder %s36_s10, %s36_s10 }
   0x4   :  { %p506_p0 = scmp.ne.s32.totalorder %s36_s10, %s505_s11  ;;  %p511_p2 = scmp.lt.s32.totalorder %s505_s11, %s505_s11 }
   0x6   :  { %p512_p3 = por %p511_p2, %p510_p1 }
   0x8   :  { %p513_p4 = pnand %p512_p3, %p506_p0 }
   0xa   :  { %516 = shalt.err (!%p513_p4)
}
   0xb   :  { %s542_s12 = smov 64   ;;  %s543_s13 = smov 4  }
   0xc   :  { %41 = dma.hbm_to_vmem [thread:$0]  %s669_s7, 256, %s36_s10, [#allocation3], %s542_s12, %s542_s12, %s543_s13  }
   0xd   :  { %537 = dma.done.wait [#allocation3], 256  }
   0xe   :  { %538 = vsyncadd [#allocation3], 4294967040  ;;  %v481_v0 = vld [vmem:[%s663_s1 + $0x8] sm:$0xff]   ;;  %v482_v1 = vld [vmem:[%s663_s1] sm:$0xff]   ;;  %vm77_vm0 = vcmask 261120   ;;  %vm133_vm1 = vcmask 523264  }
   0xf   :  { %447 = vmatprep.subr.bf16.mxu0 %v481_v0  ;;  %v48_v2 = vld [vmem:[%s662_s0] sm:$0xff]  ;;  %v49_v3 = vld [vmem:[%s662_s0 + $0x8] sm:$0xff]  ;;  %v50_v4 = vld [vmem:[%s662_s0 + $0x10] sm:$0xff] }
  0x10   :  { %448 = vmatpush3.bf16.msra.mxu0 %v481_v0  ;;  %v52_v5 = vpack.c.bf16 %v49_v3, %v48_v2  ;;  %v51_v6 = vld [vmem:[%s662_s0 + $0x18] sm:$0xff]  ;;  %v414_v8 = vld [vmem:[%s664_s2] ss:$0 sm:$0xff]  ;;  %v484_v42 = vld [vmem:[%s667_s5 + $0x10] sm:$0xff]  }
  0x11   :  { %449 = vmatprep.subr.bf16.mxu0 %v482_v1  ;;  %v53_v7 = vpack.c.bf16 %v51_v6, %v50_v4  ;;  %v483_v41 = vld [vmem:[%s667_s5 + $0x18] sm:$0xff]   ;;  %v485_v43 = vld [vmem:[%s667_s5 + $0x8] sm:$0xff]   ;;  %v486_v44 = vld [vmem:[%s667_s5] sm:$0xff]  }
  0x12   :  { %451 = vmatprep.mubr.msk.bf16.mxu0 %vm77_vm0, %v52_v5  ;;  %455 = vmatprep.subr.bf16.mxu1 %v483_v41  ;;  %v419_v58 = vld [vmem:[%s665_s3] ss:$0 sm:$0xff] }
  0x13   :  { %456 = vmatpush3.bf16.msra.mxu1 %v483_v41  ;;  %v420_v62 = vld [vmem:[%s666_s4] ss:$0 sm:$0xff] }
  0x14   :  { %450 = vmatpush3.bf16.msra.mxu0 %v482_v1  ;;  %457 = vmatprep.subr.bf16.mxu1 %v484_v42 }
  0x17   :  { %452 = vmatmul.mubr.msk.bf16.vlgmr.msra.gmra.mxu0 %vm77_vm0, %v53_v7  ;;  %458 = vmatpush3.bf16.msra.mxu1 %v484_v42 }
  0x18   :  { %459 = vmatprep.subr.bf16.mxu1 %v485_v43 }
  0x1b   :  { %460 = vmatpush3.bf16.msra.mxu1 %v485_v43 }
  0x1c   :  { %461 = vmatprep.subr.bf16.mxu1 %v486_v44 }
  0x1f   :  { %462 = vmatpush3.bf16.msra.mxu1 %v486_v44 }
  0xd7   :  { %v453_v9 = vpop.f32.mrf.mxu0 }
  0xd8   :  { %v127_v10 = vadd.f32 %v453_v9, %v414_v8 }
  0xd9   :  { %v118_v11 = vpop.f32.mrf.mxu0 }
  0xda   :  { %v119_v12 = vadd.f32 %v414_v8, %v118_v11  ;;  %v140_v13 = vsel %vm133_vm1, %v127_v10, 0.0 }
  0xdb   :  { %141 = vadd.xlane.f32.xlu1 %v140_v13  ;;  %v454_v14 = vpop.f32.mrf.mxu0 }
  0xdc   :  { %v130_v15 = vadd.f32 %v454_v14, %v414_v8  ;;  %v134_v16 = vsel %vm133_vm1, %v119_v12, 0.0 }
  0xdd   :  { %v121_v17 = vpop.f32.mrf.mxu0  ;;  %135 = vadd.xlane.f32.xlu0 %v134_v16 }
  0xde   :  { %v122_v18 = vadd.f32 %v414_v8, %v121_v17  ;;  %v143_v19 = vsel %vm133_vm1, %v130_v15, 0.0  ;;  %v487_v17 = vld [vmem:[#allocation2 + $0x8] sm:$0xff]  }
  0xdf   :  { %144 = vadd.xlane.f32.xlu1 %v143_v19  ;;  %467 = vmatprep.subr.bf16.mxu0 %v487_v17 }
  0xe0   :  { %v137_v20 = vsel %vm133_vm1, %v122_v18, 0.0  ;;  %468 = vmatpush3.bf16.msra.mxu0 %v487_v17 }
  0xe1   :  { %138 = vadd.xlane.f32.xlu0 %v137_v20 }
 0x164   :  { %v142_v21 = vpop.xlane.xlu1 %141 }
 0x165   :  { %v149_v22 = vmul.f32 0.015625, %v142_v21  ;;  %v421_v21 = vld [vmem:[%s668_s6] ss:$0 sm:$0xff]  ;;  %s544_s6 = smov [#allocation5]  }
 0x166   :  { %v136_v23 = vpop.xlane.xlu0 %135  ;;  %s402_s18 = sshll.u32 %s544_s6, 4  ;;  %s403_s18 = int_to_ptr.vmem [resolvable:$true] %s402_s18 }
 0x167   :  { %v147_v24 = vmul.f32 0.015625, %v136_v23  ;;  %v153_v26 = vsub.f32 %v127_v10, %v149_v22  ;;  %s517_s19 = scalar_lea.vmem %s403_s18, 512  ;;  %p522_p6 = scmp.lt.s32.totalorder %s403_s18, %s403_s18 }
 0x168   :  { %v145_v25 = vpop.xlane.xlu1 %144  ;;  %p518_p5 = scmp.ne.s32.totalorder %s403_s18, %s517_s19  ;;  %p523_p7 = scmp.lt.s32.totalorder %s517_s19, %s517_s19 }
 0x169   :  { %v151_v27 = vsub.f32 %v119_v12, %v147_v24  ;;  %v150_v28 = vmul.f32 0.015625, %v145_v25  ;;  %v157_v35 = vmul.f32 %v153_v26, %v153_v26 }
 0x16a   :  { %v139_v29 = vpop.xlane.xlu0 %138  ;;  %p524_p8 = por %p523_p7, %p522_p6 }
 0x16b   :  { %v148_v30 = vmul.f32 0.015625, %v139_v29  ;;  %v155_v31 = vmul.f32 %v151_v27, %v151_v27  ;;  %v154_v32 = vsub.f32 %v130_v15, %v150_v28  ;;  %v165_v37 = vsel %vm133_vm1, %v157_v35, 0.0 }
 0x16c   :  { %p525_p9 = pnand %p524_p8, %p518_p5 }
 0x16d   :  { %v152_v33 = vsub.f32 %v122_v18, %v148_v30  ;;  %v159_v34 = vsel %vm133_vm1, %v155_v31, 0.0  ;;  %v158_v39 = vmul.f32 %v154_v32, %v154_v32  ;;  %v488_v18 = vld [vmem:[#allocation2] sm:$0xff]  }
 0x16e   :  { %160 = vadd.xlane.f32.xlu0 %v159_v34  ;;  %469 = vmatprep.subr.bf16.mxu0 %v488_v18  ;;  %v428_v34 = vld [vmem:[%s670_s8] ss:$0 sm:$0xff] }
 0x16f   :  { %v156_v36 = vmul.f32 %v152_v33, %v152_v33  ;;  %v168_v40 = vsel %vm133_vm1, %v158_v39, 0.0  ;;  %470 = vmatpush3.bf16.msra.mxu0 %v488_v18 }
 0x171   :  { %v162_v38 = vsel %vm133_vm1, %v156_v36, 0.0 }
 0x172   :  { %166 = vadd.xlane.f32.xlu0 %v165_v37  ;;  %163 = vadd.xlane.f32.xlu1 %v162_v38 }
 0x176   :  { %169 = vadd.xlane.f32.xlu1 %v168_v40 }
 0x1f7   :  { %v161_v45 = vpop.xlane.xlu0 %160 }
 0x1f8   :  { %v171_v46 = vmul.f32 0.015625, %v161_v45 }
 0x1fa   :  { %v175_v47 = vadd.f32 1e-05, %v171_v46 }
 0x1fb   :  { %v164_v48 = vpop.xlane.xlu1 %163  ;;  %v167_v49 = vpop.xlane.xlu0 %166 }
 0x1fc   :  { %489 = vrsqrt.f32 %v175_v47  ;;  %v172_v50 = vmul.f32 0.015625, %v164_v48  ;;  %v173_v51 = vmul.f32 0.015625, %v167_v49 }
 0x1fe   :  { %v176_v52 = vadd.f32 1e-05, %v172_v50  ;;  %v177_v53 = vadd.f32 1e-05, %v173_v51 }
 0x1ff   :  { %v170_v54 = vpop.xlane.xlu1 %169 }
 0x200   :  { %491 = vrsqrt.f32 %v176_v52  ;;  %v174_v55 = vmul.f32 0.015625, %v170_v54 }
 0x201   :  { %493 = vrsqrt.f32 %v177_v53 }
 0x202   :  { %v178_v56 = vadd.f32 1e-05, %v174_v55 }
 0x204   :  { %495 = vrsqrt.f32 %v178_v56 }
 0x209   :  { %v490_v57 = vpop.eup %489 }
 0x20a   :  { %v183_v59 = vmul.f32 %v490_v57, %v151_v27 }
 0x20c   :  { %v194_v60 = vmul.f32 %v419_v58, %v183_v59 }
 0x20d   :  { %v492_v61 = vpop.eup %491 }
 0x20e   :  { %v494_v63 = vpop.eup %493  ;;  %v184_v0 = vmul.f32 %v492_v61, %v152_v33  ;;  %v205_v3 = vadd.f32 %v420_v62, %v194_v60 }
 0x20f   :  { %v185_v1 = vmul.f32 %v494_v63, %v153_v26 }
 0x210   :  { %v195_v2 = vmul.f32 %v419_v58, %v184_v0  ;;  %v209_v8 = vmax.f32 %v205_v3, 0.0 }
 0x211   :  { %v496_v4 = vpop.eup %495  ;;  %v196_v5 = vmul.f32 %v419_v58, %v185_v1 }
 0x212   :  { %v206_v6 = vadd.f32 %v420_v62, %v195_v2  ;;  %v186_v7 = vmul.f32 %v496_v4, %v154_v32 }
 0x213   :  { %v207_v11 = vadd.f32 %v420_v62, %v196_v5 }
 0x214   :  { %v210_v9 = vmax.f32 %v206_v6, 0.0  ;;  %v197_v10 = vmul.f32 %v419_v58, %v186_v7 }
 0x215   :  { %v211_v14 = vmax.f32 %v207_v11, 0.0 }
 0x216   :  { %v213_v12 = vpack.c.bf16 %v210_v9, %v209_v8  ;;  %v208_v13 = vadd.f32 %v420_v62, %v197_v10 }
 0x218   :  { %463 = vmatprep.mubr.msk.bf16.mxu1 %vm133_vm1, %v213_v12  ;;  %v212_v15 = vmax.f32 %v208_v13, 0.0 }
 0x21a   :  { %v214_v16 = vpack.c.bf16 %v212_v15, %v211_v14 }
 0x21c   :  { %464 = vmatmul.mubr.msk.bf16.vlgmr.msra.gmra.mxu1 %vm133_vm1, %v214_v16 }
 0x2dc   :  { %v465_v19 = vpop.f32.mrf.mxu1 }
 0x2dd   :  { %v303_v25 = vadd.f32 %v465_v19, %v421_v21 }
 0x2de   :  { %v294_v20 = vpop.f32.mrf.mxu1 }
 0x2df   :  { %v295_v23 = vadd.f32 %v421_v21, %v294_v20  ;;  %v311_v31 = vmax.f32 %v303_v25, 0.0 }
 0x2e0   :  { %v466_v22 = vpop.f32.mrf.mxu1 }
 0x2e1   :  { %v306_v24 = vadd.f32 %v466_v22, %v421_v21  ;;  %v309_v29 = vmax.f32 %v295_v23, 0.0 }
 0x2e2   :  { %v297_v26 = vpop.f32.mrf.mxu1 }
 0x2e3   :  { %v298_v27 = vadd.f32 %v421_v21, %v297_v26  ;;  %v312_v28 = vmax.f32 %v306_v24, 0.0 }
 0x2e5   :  { %v310_v30 = vmax.f32 %v298_v27, 0.0  ;;  %v314_v33 = vpack.c.bf16 %v312_v28, %v311_v31 }
 0x2e7   :  { %v313_v32 = vpack.c.bf16 %v310_v30, %v309_v29 }
 0x2e9   :  { %471 = vmatprep.mubr.msk.bf16.mxu0 %vm77_vm0, %v313_v32 }
 0x2ea   :  { %472 = vmatmul.mubr.msk.bf16.vlgmr.msra.gmra.mxu0 %vm77_vm0, %v314_v33 }
 0x3aa   :  { %v473_v35 = vpop.f32.mrf.mxu0 }
 0x3ab   :  { %v387_v36 = vadd.f32 %v473_v35, %v428_v34 }
 0x3ac   :  { %v378_v37 = vpop.f32.mrf.mxu0 }
 0x3ad   :  { %395 = vst [vmem:[#allocation5 + $0x10] sm:$0xff] %v387_v36  ;;  %v379_v38 = vadd.f32 %v428_v34, %v378_v37 }
 0x3ae   :  { %v474_v39 = vpop.f32.mrf.mxu0 }
 0x3af   :  { %393 = vst [vmem:[#allocation5] sm:$0xff] %v379_v38  ;;  %v390_v40 = vadd.f32 %v474_v39, %v428_v34 }
 0x3b0   :  { %v381_v41 = vpop.f32.mrf.mxu0 }
 0x3b1   :  { %396 = vst [vmem:[#allocation5 + $0x18] sm:$0xff] %v390_v40  ;;  %v382_v42 = vadd.f32 %v428_v34, %v381_v41 }
 0x3b3   :  { %394 = vst [vmem:[#allocation5 + $0x8] sm:$0xff] %v382_v42 }
 0x3b4   :  { %528 = shalt.err (!%p525_p9)
}
 0x3b5   :  { %s545_s8 = smov 128   ;;  %s546_s20 = smov 8  }
 0x3b6   :  { %408 = dma.vmem_to_hbm [thread:$0]  %s403_s18, 512, %s671_s9, [#allocation4], %s545_s8, %s545_s8, %s546_s20  }
 0x3b7   :  { %539 = dma.done.wait [#allocation4], 512  }
 0x3b8   :  { %540 = vsyncadd [#allocation4], 4294966784 }
 0x3b9   :  { %412 = vsyncpa [#allocation3], 1 }
 0x3ba   :  { %413 = vsyncpa [#allocation4], 1 }

</bundles_post_ra>
